<compile_context>
chip_gen: v5e
topology: v5e:2x2
jax: 0.10.0
libtpu: 0.0.40
codegen_flags: <defaults>
</compile_context>

<pallas_src>
import math

import jax
import jax.numpy as jnp
from jax.experimental import pallas as pl
from jax.experimental.pallas import tpu as pltpu


def build_grid_3d(resolution):
    """JAX port of the usual slot-attention build_grid_3d: (1, D, H, W, 6)."""
    ranges = [jnp.linspace(0.0, 1.0, num=r, dtype=jnp.float32) for r in resolution]
    mesh = jnp.meshgrid(*ranges, indexing="ij")          # 3 x (D, H, W)
    grid = jnp.stack(mesh, axis=-1)                      # (D, H, W, 3)
    grid = grid[None]                                    # (1, D, H, W, 3)
    return jnp.concatenate([grid, 1.0 - grid], axis=-1)  # (1, D, H, W, 6)


def _pos_enc_kernel(grid_ref, w_ref, b_ref, x_ref, o_ref, emb_ref):
    # grid_ref: (6, tile_s)     positional features (transposed), this spatial tile
    # w_ref:    (C, 6)          linear weight, PyTorch (out, in) layout — used as-is
    # b_ref:    (C, 1)          linear bias
    # x_ref:    (1, C, tile_s)  one batch element, channels x spatial-tile (lane axis)
    # o_ref:    (1, C, tile_s)
    # emb_ref:  (C, tile_s)     f32 VMEM scratch, cached across the (inner) batch axis
    @pl.when(pl.program_id(1) == 0)
    def _():
        emb_ref[...] = (
            jnp.dot(w_ref[...], grid_ref[...], preferred_element_type=jnp.float32)
            + b_ref[...]
        )

    o_ref[...] = (
        x_ref[...].astype(jnp.float32) + emb_ref[...][None, :, :]
    ).astype(o_ref.dtype)


def _pick_tile_s(S, C, dtype_bytes, target_block_bytes):
    """Largest multiple-of-128 divisor of S with C*tile_s*dtype <= target; else S."""
    cap = max(128, target_block_bytes // max(1, C * dtype_bytes))
    best = None
    t = 128
    limit = min(S, cap)
    while t <= limit:
        if S % t == 0:
            best = t
        t += 128
    return best if best is not None else S


def linear_position_encoding_3d(
    x_ncdhw, weight, bias, resolution, *, target_block_bytes=2 << 20
):
    """x_ncdhw: (B, C, D, H, W).  weight: (C, 6) (PyTorch layout).  bias: (C,)."""
    B, C, D, H, W = x_ncdhw.shape
    assert (D, H, W) == tuple(resolution)
    S = D * H * W
    dtype_bytes = jnp.dtype(x_ncdhw.dtype).itemsize
    tile_s = _pick_tile_s(S, C, dtype_bytes, target_block_bytes)

    # Cheap glue only: a tiny (6, S) feature table and a free reshape of the input.
    grid6_t = build_grid_3d(resolution).reshape(S, 6).T.astype(x_ncdhw.dtype)  # (6, S)
    x_flat = x_ncdhw.reshape(B, C, S)                                          # (B, C, S)
    w = weight.astype(x_ncdhw.dtype)                                           # (C, 6)
    b2 = bias.reshape(C, 1).astype(x_ncdhw.dtype)                              # (C, 1)

    # Explicit VMEM budget: double-buffered (x + out + grid) blocks + emb scratch.
    blk = C * tile_s * dtype_bytes
    vmem_need = 2 * (2 * blk + 6 * tile_s * dtype_bytes) + C * tile_s * 4 + (2 << 20)
    vmem_limit = int(min(max(vmem_need, 32 << 20), 64 << 20))

    out_flat = pl.pallas_call(
        _pos_enc_kernel,
        out_shape=jax.ShapeDtypeStruct((B, C, S), x_ncdhw.dtype),
        grid_spec=pltpu.PrefetchScalarGridSpec(
            num_scalar_prefetch=0,
            grid=(S // tile_s, B),   # spatial outer (parallel), batch inner (arbitrary)
            in_specs=[
                pl.BlockSpec((6, tile_s), lambda s, b: (0, s)),        # grid features
                pl.BlockSpec((C, 6), lambda s, b: (0, 0)),             # weight (resident)
                pl.BlockSpec((C, 1), lambda s, b: (0, 0)),             # bias (resident)
                pl.BlockSpec((1, C, tile_s), lambda s, b: (b, 0, s)),  # inputs
            ],
            out_specs=pl.BlockSpec((1, C, tile_s), lambda s, b: (b, 0, s)),
            scratch_shapes=[pltpu.VMEM((C, tile_s), jnp.float32)],
        ),
        compiler_params=pltpu.CompilerParams(
            dimension_semantics=("parallel", "arbitrary"),
            vmem_limit_bytes=vmem_limit,
        ),
    )(grid6_t, w, b2, x_flat)

    return out_flat.reshape(B, C, D, H, W)


def _reference(x_ncdhw, weight, bias, resolution):
    grid6 = build_grid_3d(resolution).astype(x_ncdhw.dtype)       # (1, D, H, W, 6)
    emb = jnp.einsum("zdhwk,ck->zdhwc", grid6, weight) + bias     # (1, D, H, W, C)
    emb = jnp.transpose(emb, (0, 4, 1, 2, 3))                     # (1, C, D, H, W)
    return x_ncdhw + emb


if __name__ == "__main__":
    hidden_size = 32
    resolution = (4, 8, 8)          # D, H, W  -> S = 256
    B = 2

    key = jax.random.PRNGKey(0)
    kx, kw, kb = jax.random.split(key, 3)

    # Deterministic parameter init (PyTorch Linear default: U(-1/sqrt(6), 1/sqrt(6))).
    bound = 1.0 / math.sqrt(6.0)
    weight = jax.random.uniform(kw, (hidden_size, 6), jnp.float32, -bound, bound)
    bias = jax.random.uniform(kb, (hidden_size,), jnp.float32, -bound, bound)

    x = jax.random.normal(kx, (B, hidden_size) + resolution, jnp.float32)  # NCDHW

    ref = _reference(x, weight, bias, resolution)

    out = linear_position_encoding_3d(x, weight, bias, resolution)
    out = jax.block_until_ready(out)

    assert out.shape == x.shape
    assert jnp.allclose(out, ref, atol=1e-5, rtol=1e-5)

    print("KERNEL_OK")
</pallas_src>

<mosaic_0001>
module attributes {stable_mosaic.version = 11 : i64} {
  func.func @_pos_enc_kernel(%arg0: i32, %arg1: i32, %arg2: memref<6x256xf32, #tpu.memory_space<vmem>>, %arg3: memref<32x6xf32, #tpu.memory_space<vmem>>, %arg4: memref<32x1xf32, #tpu.memory_space<vmem>>, %arg5: memref<1x32x256xf32, #tpu.memory_space<vmem>>, %arg6: memref<1x32x256xf32, #tpu.memory_space<vmem>>, %arg7: memref<32x256xf32, #tpu.memory_space<vmem>>) attributes {dimension_semantics = [#tpu.dimension_semantics<parallel>, #tpu.dimension_semantics<arbitrary>], iteration_bounds = array<i64: 1, 2>, scalar_prefetch = 0 : i64, scratch_operands = 1 : i64, tpu.core_type = #tpu.core_type<tc>, window_params = [{transform_indices = @transform_0, window_bounds = array<i64: 6, 256>}, {pipeline_mode = #tpu.pipeline_mode<synchronous>, transform_indices = @transform_1, window_bounds = array<i64: 32, 6>}, {pipeline_mode = #tpu.pipeline_mode<synchronous>, transform_indices = @transform_2, window_bounds = array<i64: 32, 1>}, {transform_indices = @transform_3, window_bounds = array<i64: 1, 32, 256>}, {transform_indices = @transform_4, window_bounds = array<i64: 1, 32, 256>}]} {
    %c0_i32 = arith.constant 0 : i32
    %0 = arith.cmpi eq, %arg1, %c0_i32 : i32
    %1 = arith.extui %0 : i1 to i32
    %c0_i32_0 = arith.constant 0 : i32
    %2 = arith.cmpi ne, %1, %c0_i32_0 : i32
    scf.if %2 {
      %c0_8 = arith.constant 0 : index
      %c0_9 = arith.constant 0 : index
      %8 = vector.load %arg3[%c0_8, %c0_9] : memref<32x6xf32, #tpu.memory_space<vmem>>, vector<32x6xf32>
      %c0_10 = arith.constant 0 : index
      %c0_11 = arith.constant 0 : index
      %9 = vector.load %arg2[%c0_10, %c0_11] : memref<6x256xf32, #tpu.memory_space<vmem>>, vector<6x256xf32>
      %cst = arith.constant dense<0.000000e+00> : vector<32x256xf32>
      %10 = tpu.matmul %8, %9, %cst {dimension_numbers = #tpu.dot_dimension_numbers<[1], [0], [0], [1], [0, 0, 1, 1], [], []>} : vector<32x6xf32>, vector<6x256xf32>, vector<32x256xf32> -> vector<32x256xf32>
      %c0_12 = arith.constant 0 : index
      %c0_13 = arith.constant 0 : index
      %11 = vector.load %arg4[%c0_12, %c0_13] : memref<32x1xf32, #tpu.memory_space<vmem>>, vector<32x1xf32>
      %12 = vector.broadcast %11 : vector<32x1xf32> to vector<32x256xf32>
      %13 = arith.addf %10, %12 : vector<32x256xf32>
      %c0_14 = arith.constant 0 : index
      %c0_15 = arith.constant 0 : index
      %14 = vector.load %arg7[%c0_14, %c0_15] : memref<32x256xf32, #tpu.memory_space<vmem>>, vector<32x256xf32>
      tpu.vector_store %arg7[%c0_14, %c0_15], %13 {strides = array<i32>} : memref<32x256xf32, #tpu.memory_space<vmem>>, vector<32x256xf32>,
    } else {
    }
    %c0 = arith.constant 0 : index
    %c0_1 = arith.constant 0 : index
    %c0_2 = arith.constant 0 : index
    %3 = vector.load %arg5[%c0, %c0_1, %c0_2] : memref<1x32x256xf32, #tpu.memory_space<vmem>>, vector<1x32x256xf32>
    %c0_3 = arith.constant 0 : index
    %c0_4 = arith.constant 0 : index
    %4 = vector.load %arg7[%c0_3, %c0_4] : memref<32x256xf32, #tpu.memory_space<vmem>>, vector<32x256xf32>
    %5 = vector.shape_cast %4 : vector<32x256xf32> to vector<1x32x256xf32>
    %6 = arith.addf %3, %5 : vector<1x32x256xf32>
    %c0_5 = arith.constant 0 : index
    %c0_6 = arith.constant 0 : index
    %c0_7 = arith.constant 0 : index
    %7 = vector.load %arg6[%c0_5, %c0_6, %c0_7] : memref<1x32x256xf32, #tpu.memory_space<vmem>>, vector<1x32x256xf32>
    tpu.vector_store %arg6[%c0_5, %c0_6, %c0_7], %6 {strides = array<i32>} : memref<1x32x256xf32, #tpu.memory_space<vmem>>, vector<1x32x256xf32>,
    return
  }
  func.func @transform_0(%arg0: i32, %arg1: i32) -> (i32, i32) {
    %c0_i32 = arith.constant 0 : i32
    %c0_i32_0 = arith.constant 0 : i32
    return %c0_i32, %arg0 : i32, i32
  }
  func.func @transform_1(%arg0: i32, %arg1: i32) -> (i32, i32) {
    %c0_i32 = arith.constant 0 : i32
    %c0_i32_0 = arith.constant 0 : i32
    %c0_i32_1 = arith.constant 0 : i32
    return %c0_i32, %c0_i32_0 : i32, i32
  }
  func.func @transform_2(%arg0: i32, %arg1: i32) -> (i32, i32) {
    %c0_i32 = arith.constant 0 : i32
    %c0_i32_0 = arith.constant 0 : i32
    %c0_i32_1 = arith.constant 0 : i32
    return %c0_i32, %c0_i32_0 : i32, i32
  }
  func.func @transform_3(%arg0: i32, %arg1: i32) -> (i32, i32, i32) {
    %c0_i32 = arith.constant 0 : i32
    %c0_i32_0 = arith.constant 0 : i32
    return %arg1, %c0_i32, %arg0 : i32, i32, i32
  }
  func.func @transform_4(%arg0: i32, %arg1: i32) -> (i32, i32, i32) {
    %c0_i32 = arith.constant 0 : i32
    %c0_i32_0 = arith.constant 0 : i32
    return %arg1, %c0_i32, %arg0 : i32, i32, i32
  }
}

</mosaic_0001>

<bundles_post_ra>
// kernel: tpu_custom_call.1
= control target key start
LH: loop header
LB: loop body
LE: loop exit
PB: predicated region body
PF: predicated region fallthrough
CT: control target
= control target key end

     0   :  { %9 = vsyncpa [#allocation4], 0  ;;  %s956_s0 = inlined_call_operand.vmem [shape: f32[6,256], index: 0, kind: input, shape index: {}]   ;;  %s957_s1 = inlined_call_operand.vmem [shape: f32[32,6], index: 1, kind: input, shape index: {}]   ;;  %s958_s2 = inlined_call_operand.vmem [shape: f32[32,1], index: 2, kind: input, shape index: {}]   ;;  %s959_s3 = inlined_call_operand.hbm [shape: f32[2,32,256], index: 3, kind: input, shape index: {}]   ;;  %s960_s4 = inlined_call_operand.hbm [shape: f32[2,32,256], index: 4, kind: output, shape index: {}]  }
   0x1   :  { %11 = vsyncpa [#allocation4 + $0x1], 0 }
   0x2   :  { %12 = vsyncpa [#allocation5], 0 }
   0x3   :  { %14 = vsyncpa [#allocation5 + $0x1], 0  ;;  %s776_s15 = smov 0   ;;  %s778_s16 = smov 0  }
   0x4   :  { %s780_s17 = smov 0   ;;  %s782_s18 = smov 0  }
   0x5   :  { %s784_s19 = smov 0   ;;  %s786_s20 = smov 0  }
   0x6 LB: > { %s532_s21 = sadd.s32 4294967295, %s744_s20   ;;  %s533_s22 = sadd.s32 4294967294, %s744_s20   ;;  %s744_s20 = sphi %s786_s20, %s20_s20   ;;  %s740_s19 = sphi %s784_s19, %s969_s19   ;;  %s736_s18 = sphi %s782_s18, %s968_s18   ;;  %s732_s17 = sphi %s780_s17, %s967_s17   ;;  %s728_s16 = sphi %s778_s16, %s966_s16   ;;  %s724_s15 = sphi %s776_s15, %s965_s15  }
   0x7   : > { %s29_s23 = sadd.s32 1, %s740_s19  ;;  %s109_s24 = sadd.s32 1, %s732_s17 }
   0x8   : > { %p30_p0 = scmp.ge.s32.totalorder %s29_s23, 2  ;;  %p116_p1 = scmp.ne.s32.totalorder %s732_s17, %s728_s16 }
   0x9   : > { %p117_p2 = scmp.eq.s32.totalorder %s744_s20, 0  ;;  %p122_p3 = scmp.ne.s32.totalorder %s728_s16, %s724_s15 }
   0xa   : > { %s971_s23 = smov (%p30_p0, %s29_s23), 0  ;;  %p123_p5 = scmp.eq.s32.totalorder %s532_s21, 0 }
   0xb   : > { %p817_p4 = por %p117_p2, %p116_p1  ;;  %s104_s26 = ssub.s32 %s740_s19, %s971_s23 }
   0xc   : > { %p148_p6 = scmp.eq.s32.totalorder %s532_s21, 1  ;;  %p107_p7 = scmp.eq.s32.totalorder %s104_s26, 0 }
   0xd   : > { %p823_p8 = por %p123_p5, %p122_p3  ;;  %p154_p10 = scmp.eq.s32.totalorder %s533_s22, 1 }
   0xe   : > { %p827_p9 = por %p148_p6, %p116_p1  ;;  %p536_p12 = scmp.ge.s32.totalorder %s744_s20, 2 }
   0xf   : > { %s832_s29 = scalar_select %p107_p7, %s732_s17, %s109_s24  }
  0x10   : > { %p834_p11 = por %p154_p10, %p122_p3  ;;  %p575_p13 = scmp.lt.s32.totalorder %s744_s20, 2 }
  0x11   : > { %s189_s5 = sand.u32 1, %s732_s17   ;;  %s559_s7 = sshll.u32 %s740_s19, 6 }
  0x12   : > { %s537_s6 = sshll.u32 %s189_s5, 6  ;;  %s200_s10 = scalar_lea.hbm %s959_s3, %s559_s7 }
  0x13   : > { %s193_s11 = scalar_lea.vmem [#allocation3], %s537_s6  ;;  %s201_s13 = sshll.u32 %s200_s10, 4  ;;  %s202_s13 = int_to_ptr.hbm [resolvable:$true] %s201_s13 }
  0x14   : > { %s203_s12 = sshll.u32 %s193_s11, 4  ;;  %p568_p0 = pnand %p575_p13, %p817_p4  ;;  %s204_s12 = int_to_ptr.vmem [resolvable:$true] %s203_s12 }
  0x15   : > { %p540_p1 = scmp.ge.s32.totalorder %s744_s20, 1  ;;  %s190_s14 = scalar_lea.sflag [#allocation4], %s189_s5 }
  0x16   : > { %s746_s21 = smov 256   ;;  %s747_s22 = smov 16  }
  0x17   : > { %570 = dma.hbm_to_vmem [thread:$0]  (!%p568_p0), %s202_s13, 1024, %s204_s12, %s190_s14, %s746_s21, %s746_s21, %s747_s22  }
  0x18   : > { %p211_p2 = scmp.lt.s32.totalorder %s744_s20, 3 }
  0x1a   : > { %p212_p3 = pnand %p540_p1, %p211_p2 }
  0x1b   : > { %s850_s24 = sand.u32 (!%p212_p3), 1, %s728_s16  }
  0x1c   : > { %215 = sbr.rel (%p212_p3) target bundleno = 204 (0xcc), region = 36  ;;  %s541_s26 = sshll.u32 (!%p212_p3), %s850_s24, 6 }
  0x1d   : > { %s218_s6 = scalar_lea.sflag (!%p212_p3), [#allocation4], %s850_s24  ;;  %s854_s7 = scalar_lea.vmem (!%p212_p3), [#allocation3], %s541_s26 }
  0x21   : > { %715 = dma.done.wait (%p823_p8), %s218_s6, 1024  }
  0x22   : > { %717 = vsyncadd (%p823_p8), %s218_s6, 4294966272  ;;  %s860_s25 = scalar_lea.vmem [#allocation6], %s541_s26  ;;  %p543_p4 = scmp.ne.s32.totalorder %s736_s18, 0 }
  0x24   : > { %263 = sbr.rel (%p543_p4) target bundleno = 188 (0xbc), region = 44 }
  0x29   : > { %v268_v0 = vld [vmem:[%s956_s0] sm:$0x3f]  ;;  %vm307_vm0 = vcmask 1045504   ;;  %v269_v1 = vld [vmem:[%s956_s0 + $0x8] sm:$0x3f]  ;;  %vm294_vm1 = vcmask 48128  }
  0x2a   : > { %v264_v2 = vld [vmem:[%s957_s1] sm:$0xff]  ;;  %544 = vmatpush.msk.msra.mxu0 %vm307_vm0, %v268_v0  ;;  %561 = vmatpush.msk.msra.mxu2 %vm307_vm0, %v268_v0  ;;  %v266_v3 = vld [vmem:[%s957_s1 + $0x10] sm:$0xff]  ;;  %v748_v6 = vmov 0   ;;  %v265_v7 = vld [vmem:[%s957_s1 + $0x8] sm:$0xff] }
  0x2b   : > { %549 = vmatpush.msk.msra.mxu1 %vm307_vm0, %v269_v1  ;;  %562 = vmatpush.msk.msra.mxu3 %vm307_vm0, %v269_v1  ;;  %v272_v4 = vld [vmem:[%s958_s2 + $0x10] sm:$0xff]  ;;  %v270_v5 = vld [vmem:[%s958_s2] sm:$0xff]  ;;  %v267_v8 = vld [vmem:[%s957_s1 + $0x18] sm:$0xff] }
  0x2c   : > { %545 = vmatmul.msk.f32.vlgmr.msra.gmra.mxu0 %vm294_vm1, %v264_v2  ;;  %547 = vmatmul.msk.f32.vlgmr.msra.gmra.mxu2 %vm294_vm1, %v266_v3  ;;  %v273_v9 = vld [vmem:[%s958_s2 + $0x18] sm:$0xff]  ;;  %v271_v10 = vld [vmem:[%s958_s2 + $0x8] sm:$0xff] }
  0x2d   : > { %550 = vmatmul.msk.f32.vlgmr.msra.gmra.mxu1 %vm294_vm1, %v264_v2  ;;  %552 = vmatmul.msk.f32.vlgmr.msra.gmra.mxu3 %vm294_vm1, %v266_v3 }
  0x2e   : > { %631 = vset.pattern.permute.xlu1 %v748_v6  ;;  %630 = vset.pattern.permute.xlu0 %v748_v6 }
  0x2f   : > { %286 = vperm.xlu1 %631, %v272_v4   ;;  %276 = vperm.xlu0 %630, %v270_v5  }
  0x34   : > { %546 = vmatmul.msk.f32.gmra.mxu0 %vm294_vm1, %v265_v7  ;;  %548 = vmatmul.msk.f32.gmra.mxu2 %vm294_vm1, %v267_v8 }
  0x35   : > { %551 = vmatmul.msk.f32.gmra.mxu1 %vm294_vm1, %v265_v7  ;;  %553 = vmatmul.msk.f32.gmra.mxu3 %vm294_vm1, %v267_v8 }
  0x37   : > { %291 = vperm.xlu1 %631, %v273_v9   ;;  %281 = vperm.xlu0 %630, %v271_v10  }
  0xa1   : > { %v277_v11 = vpop.permute.xlu0 %276  ;;  %v287_v16 = vpop.permute.xlu1 %286 }
  0xa9   : > { %v331_v12 = vpop.f32.mrf.mxu0  ;;  %v282_v20 = vpop.permute.xlu0 %281 }
  0xaa   : > { %v332_v13 = vadd.f32 %v331_v12, %v277_v11  ;;  %v360_v14 = vpop.f32.mrf.mxu1  ;;  %v292_v26 = vpop.permute.xlu1 %291 }
  0xab   : > { %v361_v15 = vadd.f32 %v360_v14, %v277_v11 }
  0xac   : > { %372 = vst [vmem:[#allocation2 + $0x30] sm:$0xff] %v332_v13 }
  0xad   : > { %373 = vst [vmem:[#allocation2] sm:$0xff] %v361_v15 }
  0xaf   : > { %v337_v17 = vpop.f32.mrf.mxu2 }
  0xb0   : > { %v338_v18 = vadd.f32 %v337_v17, %v287_v16  ;;  %v366_v19 = vpop.f32.mrf.mxu3 }
  0xb1   : > { %v367_v21 = vadd.f32 %v366_v19, %v287_v16  ;;  %v334_v22 = vpop.f32.mrf.mxu0 }
  0xb2   : > { %376 = vst [vmem:[#allocation2 + $0x8] sm:$0xff] %v338_v18  ;;  %v335_v23 = vadd.f32 %v334_v22, %v282_v20  ;;  %v363_v24 = vpop.f32.mrf.mxu1 }
  0xb3   : > { %377 = vst [vmem:[#allocation2 + $0x20] sm:$0xff] %v367_v21  ;;  %v364_v25 = vadd.f32 %v363_v24, %v282_v20 }
  0xb4   : > { %374 = vst [vmem:[#allocation2 + $0x18] sm:$0xff] %v335_v23 }
  0xb5   : > { %375 = vst [vmem:[#allocation2 + $0x10] sm:$0xff] %v364_v25 }
  0xb7   : > { %v340_v27 = vpop.f32.mrf.mxu2 }
  0xb8   : > { %v341_v28 = vadd.f32 %v340_v27, %v292_v26  ;;  %v369_v29 = vpop.f32.mrf.mxu3 }
  0xb9   : > { %v370_v30 = vadd.f32 %v369_v29, %v292_v26 }
  0xba   : > { %378 = vst [vmem:[#allocation2 + $0x28] sm:$0xff] %v341_v28 }
  0xbb   : > { %379 = vst [vmem:[#allocation2 + $0x38] sm:$0xff] %v370_v30 }
  0xbc PF: > { %v380_v31 = vld [vmem:[%s854_s7] sm:$0xff]  ;;  %v388_v32 = vld [vmem:[#allocation2 + $0x30] sm:$0xff]  ;;  %v381_v33 = vld [vmem:[%s854_s7 + $0x8] sm:$0xff]  ;;  %s560_s13 = sshll.u32 %s736_s18, 6  ;;  %s427_s18 = sshll.u32 %s860_s25, 4  ;;  %s428_s18 = int_to_ptr.vmem [resolvable:$true] %s427_s18 }
  0xbd   : > { %v396_v34 = vadd.f32 %v388_v32, %v380_v31  ;;  %v389_v35 = vld [vmem:[#allocation2] sm:$0xff]  ;;  %v382_v36 = vld [vmem:[%s854_s7 + $0x10] sm:$0xff]  ;;  %v390_v37 = vld [vmem:[#allocation2 + $0x18] sm:$0xff]  ;;  %s426_s22 = scalar_lea.hbm %s960_s4, %s560_s13  ;;  %s413_s6 = scalar_lea.sflag [#allocation5], %s850_s24 }
  0xbe   : > { %v397_v38 = vadd.f32 %v389_v35, %v381_v33  ;;  %v398_v39 = vadd.f32 %v390_v37, %v382_v36  ;;  %v383_v40 = vld [vmem:[%s854_s7 + $0x18] sm:$0xff]  ;;  %v391_v41 = vld [vmem:[#allocation2 + $0x10] sm:$0xff]  ;;  %v384_v42 = vld [vmem:[%s854_s7 + $0x20] sm:$0xff]  ;;  %s429_s26 = sshll.u32 %s426_s22, 4  ;;  %s682_s10 = scalar_lea.hbm %s960_s4, 128  ;;  %s430_s26 = int_to_ptr.hbm [resolvable:$true] %s429_s26 }
  0xbf   : > { %404 = vst [vmem:[%s860_s25] sm:$0xff] %v396_v34  ;;  %v399_v43 = vadd.f32 %v391_v41, %v383_v40  ;;  %v392_v44 = vld [vmem:[#allocation2 + $0x8] sm:$0xff]  ;;  %v393_v46 = vld [vmem:[#allocation2 + $0x20] sm:$0xff]  ;;  %v386_v49 = vld [vmem:[%s854_s7 + $0x30] sm:$0xff]  ;;  %s676_s5 = sshra.s32 %s430_s26, 4  ;;  %s677_s5 = int_to_ptr.hbm [resolvable:$true] %s676_s5 }
  0xc0   : > { %v385_v45 = vld [vmem:[%s854_s7 + $0x28] sm:$0xff]  ;;  %405 = vst [vmem:[%s860_s25 + $0x8] sm:$0xff] %v397_v38  ;;  %v400_v47 = vadd.f32 %v392_v44, %v384_v42  ;;  %v387_v51 = vld [vmem:[%s854_s7 + $0x38] sm:$0xff]  ;;  %s678_s8 = scalar_lea.hbm %s677_s5, 64  ;;  %p683_p8 = scmp.lt.s32.totalorder %s677_s5, %s960_s4 }
  0xc1   : > { %v401_v48 = vadd.f32 %v393_v46, %v385_v45  ;;  %v394_v50 = vld [vmem:[#allocation2 + $0x28] sm:$0xff]  ;;  %406 = vst [vmem:[%s860_s25 + $0x10] sm:$0xff] %v398_v39  ;;  %p679_p5 = scmp.ne.s32.totalorder %s677_s5, %s678_s8  ;;  %p684_p10 = scmp.lt.s32.totalorder %s682_s10, %s678_s8 }
  0xc2   : > { %v402_v52 = vadd.f32 %v394_v50, %v386_v49  ;;  %v395_v53 = vld [vmem:[#allocation2 + $0x38] sm:$0xff]  ;;  %407 = vst [vmem:[%s860_s25 + $0x18] sm:$0xff] %v399_v43 }
  0xc3   : > { %v403_v54 = vadd.f32 %v395_v53, %v387_v51  ;;  %408 = vst [vmem:[%s860_s25 + $0x20] sm:$0xff] %v400_v47  ;;  %p680_p6 = pnand %p679_p5, %p827_p9  ;;  %p685_p13 = por %p684_p10, %p683_p8 }
  0xc4   : > { %409 = vst [vmem:[%s860_s25 + $0x28] sm:$0xff] %v401_v48 }
  0xc5   : > { %410 = vst [vmem:[%s860_s25 + $0x30] sm:$0xff] %v402_v52  ;;  %p681_p7 = pneg %p680_p6 }
  0xc6   : > { %411 = vst [vmem:[%s860_s25 + $0x38] sm:$0xff] %v403_v54 }
  0xc7   : > { %p686_p0 = pnand %p685_p13, %p681_p7 }
  0xc9   : > { %689 = shalt.err (!%p686_p0)
}
  0xca   : > { %s749_s24 = smov 256   ;;  %s750_s25 = smov 16  }
  0xcb   : > { %565 = dma.vmem_to_hbm [thread:$0]  (%p827_p9), %s428_s18, 1024, %s430_s26, %s413_s6, %s749_s24, %s749_s24, %s750_s25  }
  0xcc PF: > { %s444_s27 = sand.u32 1, %s724_s15   ;;  %p572_p1 = pnand %p536_p12, %p834_p11 }
  0xcd   : > { %s445_s13 = scalar_lea.sflag [#allocation5], %s444_s27 }
  0xce   : > { %p573_p2 = pneg %p572_p1 }
  0xd0   : > { %719 = dma.done.wait (%p573_p2), %s445_s13, 1024  }
  0xd1   : > { %721 = vsyncadd (%p573_p2), %s445_s13, 4294966272  ;;  %s20_s20 = sadd.s32 1, %s744_s20   ;;  %s965_s15 = smov %s728_s16 }
  0xd2   : > { %p17_p3 = scmp.ge.s32.totalorder %s20_s20, 4   ;;  %s966_s16 = smov %s732_s17 }
  0xd3   : > { %s967_s17 = smov %s832_s29  ;;  %s968_s18 = smov %s740_s19 }
  0xd4   : > { %s969_s19 = smov %s971_s23  ;;  %19 = sbr.rel (!%p17_p3) target bundleno = 6 (0x6), region = 88 }
  0xd9   :  { %451 = vsyncpa [#allocation4], 1 }
  0xda   :  { %453 = vsyncpa [#allocation4 + $0x1], 1 }
  0xdb   :  { %454 = vsyncpa [#allocation5], 1 }
  0xdc   :  { %456 = vsyncpa [#allocation5 + $0x1], 1 }

</bundles_post_ra>
